<compile_context>
chip_gen: v5e
topology: v5e:2x2
jax: 0.10.0
libtpu: 0.0.40
codegen_flags: <defaults>
</compile_context>

<pallas_src>
import jax
import jax.numpy as jnp
from jax.experimental import pallas as pl
from jax.experimental.pallas import tpu as pltpu


def _fs_mul_kernel(flat_ref, gt_ref, out1_ref, out2_ref):
    """One (TM, F) row tile: multiply by the VMEM-resident (2, F) gates."""
    flat = flat_ref[...]                          # (TM, F), storage dtype
    out1_ref[...] = flat * gt_ref[0:1, :]         # feature1
    out2_ref[...] = flat * gt_ref[1:2, :]         # feature2


def _gate(bias, w1, b1, w2, b2):
    """MLP_Block: Linear -> ReLU -> Linear -> Sigmoid, then * 2.  Shape (1, F)."""
    h = jnp.maximum(bias @ w1 + b1, 0.0)          # (1, H)
    return jax.nn.sigmoid(h @ w2 + b2) * 2.0      # (1, F)


def feature_selection_forward(flat_emb, fs1_bias, fs2_bias, params, *, tm=4096):
    """flat_emb: (B, L, F).  fs*_bias: (1, E).  params: dict of gate weights.

    VMEM budget: 3 pipelined streams (1 input + 2 outputs) x 2 buffers x
    (tm * F * itemsize).  At the default tm=4096, F=128, f32 that is 12 MiB
    scoped -- inside every chip's scoped-VMEM default -- and we still set
    vmem_limit_bytes explicitly (capped at 48 MiB) so larger tm / F values
    keep working without tripping v7x's 64 MiB physical ceiling.
    """
    B, L, F = flat_emb.shape
    M = B * L
    dtype = flat_emb.dtype
    itemsize = jnp.dtype(dtype).itemsize
    flat2d = flat_emb.reshape(M, F)

    # Row-constant gates: computed once per call (not per row / per tile),
    # packed into one (2, F) tensor and cast to the storage dtype so the
    # kernel multiply stays in that dtype.
    gt1 = _gate(fs1_bias.astype(jnp.float32),
                params["w1a"], params["b1a"], params["w2a"], params["b2a"])
    gt2 = _gate(fs2_bias.astype(jnp.float32),
                params["w1b"], params["b1b"], params["w2b"], params["b2b"])
    gates = jnp.concatenate([gt1, gt2], axis=0).astype(dtype)   # (2, F)

    # Dtype-aware row-tile rounding: minimum sublane tile is 8 rows for f32,
    # 16 for bf16, 32 for int8/fp8.
    min_rows = {4: 8, 2: 16, 1: 32}.get(itemsize, 8)
    tm_eff = min(tm, M)
    if tm_eff < M:
        tm_eff = max(min_rows, (tm_eff // min_rows) * min_rows)
    grid = (pl.cdiv(M, tm_eff),)

    row_spec = pl.BlockSpec((tm_eff, F), lambda i: (i, 0))
    gate_spec = pl.BlockSpec((2, F), lambda i: (0, 0))   # same block every step -> stays resident

    # 3 streams x 2 buffers x tile, plus the tiny resident gates, plus headroom.
    tile_bytes = tm_eff * F * itemsize
    vmem_bytes = 6 * tile_bytes + 4 * (2 * F * itemsize) + (4 << 20)
    vmem_bytes = int(min(max(vmem_bytes, 16 << 20), 48 << 20))

    cost = pl.CostEstimate(
        flops=2 * M * F,                      # two multiplies per element
        transcendentals=0,
        bytes_accessed=3 * M * F * itemsize,  # 1 read + 2 writes of (M, F)
    )

    out1, out2 = pl.pallas_call(
        _fs_mul_kernel,
        out_shape=(jax.ShapeDtypeStruct((M, F), dtype),
                   jax.ShapeDtypeStruct((M, F), dtype)),
        grid_spec=pltpu.PrefetchScalarGridSpec(
            num_scalar_prefetch=0,
            grid=grid,
            in_specs=[row_spec, gate_spec],
            out_specs=[row_spec, row_spec],
        ),
        compiler_params=pltpu.CompilerParams(
            dimension_semantics=("parallel",),   # row tiles are independent
            vmem_limit_bytes=vmem_bytes),
        cost_estimate=cost,
    )(flat2d, gates)

    return out1.reshape(B, L, F), out2.reshape(B, L, F)


def _reference(flat_emb, fs1_bias, fs2_bias, p):
    B, L, F = flat_emb.shape
    def gate(bias, w1, b1, w2, b2):
        x = jnp.broadcast_to(bias[:, None, :], (B, L, bias.shape[1]))
        h = jnp.maximum(x @ w1 + b1, 0.0)
        return jax.nn.sigmoid(h @ w2 + b2) * 2.0
    gt1 = gate(fs1_bias, p["w1a"], p["b1a"], p["w2a"], p["b2a"])
    gt2 = gate(fs2_bias, p["w1b"], p["b1b"], p["w2b"], p["b2b"])
    return flat_emb * gt1, flat_emb * gt2


if __name__ == "__main__":
    # Small shapes consistent with FinalMLP: B batches, L items, 4 fields of
    # embedding_dim=32  ->  flat_emb feature_dim F = 128.
    B, L = 2, 16
    E = 32          # embedding_dim
    H = 64          # fs_hidden_units = [64]
    F = 128         # feature_dim = num_fields * embedding_dim

    key = jax.random.PRNGKey(0)
    ks = jax.random.split(key, 12)

    flat_emb = jax.random.normal(ks[0], (B, L, F), dtype=jnp.float32)

    # fs*_ctx_bias: nn.Parameter(torch.zeros(1, E)) -- deterministic random
    # values here so the gate MLP path is numerically exercised.
    fs1_bias = 0.1 * jax.random.normal(ks[1], (1, E), dtype=jnp.float32)
    fs2_bias = 0.1 * jax.random.normal(ks[2], (1, E), dtype=jnp.float32)

    def lin(k, fan_in, shape):
        return jax.random.normal(k, shape, dtype=jnp.float32) / jnp.sqrt(fan_in)

    params = {
        # fs1_gate MLP: Linear(E,H) -> ReLU -> Linear(H,F) -> Sigmoid
        "w1a": lin(ks[3], E, (E, H)), "b1a": lin(ks[4], E, (1, H)),
        "w2a": lin(ks[5], H, (H, F)), "b2a": lin(ks[6], H, (1, F)),
        # fs2_gate MLP
        "w1b": lin(ks[7], E, (E, H)), "b1b": lin(ks[8], E, (1, H)),
        "w2b": lin(ks[9], H, (H, F)), "b2b": lin(ks[10], H, (1, F)),
    }

    ref1, ref2 = _reference(flat_emb, fs1_bias, fs2_bias, params)

    # Default (single-tile at this small M) path.
    feat1, feat2 = feature_selection_forward(flat_emb, fs1_bias, fs2_bias, params)
    jax.block_until_ready((feat1, feat2))
    assert jnp.allclose(feat1, ref1, atol=1e-5, rtol=1e-5)
    assert jnp.allclose(feat2, ref2, atol=1e-5, rtol=1e-5)

    # Multi-step tiled path (grid of 4) to validate the pipelined row tiling.
    feat1t, feat2t = feature_selection_forward(flat_emb, fs1_bias, fs2_bias, params, tm=8)
    jax.block_until_ready((feat1t, feat2t))
    assert jnp.allclose(feat1t, ref1, atol=1e-5, rtol=1e-5)
    assert jnp.allclose(feat2t, ref2, atol=1e-5, rtol=1e-5)

    # bf16 path exercises the dtype-aware tile rounding (16-row minimum) and
    # the storage-dtype multiply.
    flat_bf16 = flat_emb.astype(jnp.bfloat16)
    ref1b, ref2b = _reference(flat_bf16.astype(jnp.float32), fs1_bias, fs2_bias, params)
    f1b, f2b = feature_selection_forward(flat_bf16, fs1_bias, fs2_bias, params, tm=16)
    jax.block_until_ready((f1b, f2b))
    assert jnp.allclose(f1b.astype(jnp.float32), ref1b, atol=2e-2, rtol=2e-2)
    assert jnp.allclose(f2b.astype(jnp.float32), ref2b, atol=2e-2, rtol=2e-2)

    print("KERNEL_OK")
</pallas_src>

<mosaic_0001>
module attributes {stable_mosaic.version = 11 : i64} {
  func.func @_fs_mul_kernel(%arg0: i32, %arg1: memref<32x128xf32, #tpu.memory_space<vmem>>, %arg2: memref<2x128xf32, #tpu.memory_space<vmem>>, %arg3: memref<32x128xf32, #tpu.memory_space<vmem>>, %arg4: memref<32x128xf32, #tpu.memory_space<vmem>>) attributes {dimension_semantics = [#tpu.dimension_semantics<parallel>], iteration_bounds = array<i64: 1>, scalar_prefetch = 0 : i64, scratch_operands = 0 : i64, tpu.core_type = #tpu.core_type<tc>, window_params = [{transform_indices = @transform_0, window_bounds = array<i64: 32, 128>}, {pipeline_mode = #tpu.pipeline_mode<synchronous>, transform_indices = @transform_1, window_bounds = array<i64: 2, 128>}, {transform_indices = @transform_2, window_bounds = array<i64: 32, 128>}, {transform_indices = @transform_3, window_bounds = array<i64: 32, 128>}]} {
    %c0 = arith.constant 0 : index
    %c0_0 = arith.constant 0 : index
    %0 = vector.load %arg1[%c0, %c0_0] : memref<32x128xf32, #tpu.memory_space<vmem>>, vector<32x128xf32>
    %c0_1 = arith.constant 0 : index
    %c0_2 = arith.constant 0 : index
    %1 = vector.load %arg2[%c0_1, %c0_2] : memref<2x128xf32, #tpu.memory_space<vmem>>, vector<1x128xf32>
    %2 = vector.broadcast %1 : vector<1x128xf32> to vector<32x128xf32>
    %3 = arith.mulf %0, %2 : vector<32x128xf32>
    %c0_3 = arith.constant 0 : index
    %c0_4 = arith.constant 0 : index
    %4 = vector.load %arg3[%c0_3, %c0_4] : memref<32x128xf32, #tpu.memory_space<vmem>>, vector<32x128xf32>
    tpu.vector_store %arg3[%c0_3, %c0_4], %3 {strides = array<i32>} : memref<32x128xf32, #tpu.memory_space<vmem>>, vector<32x128xf32>,
    %c1 = arith.constant 1 : index
    %c0_5 = arith.constant 0 : index
    %5 = vector.load %arg2[%c1, %c0_5] : memref<2x128xf32, #tpu.memory_space<vmem>>, vector<1x128xf32>
    %6 = vector.broadcast %5 : vector<1x128xf32> to vector<32x128xf32>
    %7 = arith.mulf %0, %6 : vector<32x128xf32>
    %c0_6 = arith.constant 0 : index
    %c0_7 = arith.constant 0 : index
    %8 = vector.load %arg4[%c0_6, %c0_7] : memref<32x128xf32, #tpu.memory_space<vmem>>, vector<32x128xf32>
    tpu.vector_store %arg4[%c0_6, %c0_7], %7 {strides = array<i32>} : memref<32x128xf32, #tpu.memory_space<vmem>>, vector<32x128xf32>,
    return
  }
  func.func @transform_0(%arg0: i32) -> (i32, i32) {
    %c0_i32 = arith.constant 0 : i32
    %c0_i32_0 = arith.constant 0 : i32
    return %arg0, %c0_i32 : i32, i32
  }
  func.func @transform_1(%arg0: i32) -> (i32, i32) {
    %c0_i32 = arith.constant 0 : i32
    %c0_i32_0 = arith.constant 0 : i32
    %c0_i32_1 = arith.constant 0 : i32
    return %c0_i32, %c0_i32_0 : i32, i32
  }
  func.func @transform_2(%arg0: i32) -> (i32, i32) {
    %c0_i32 = arith.constant 0 : i32
    %c0_i32_0 = arith.constant 0 : i32
    return %arg0, %c0_i32 : i32, i32
  }
  func.func @transform_3(%arg0: i32) -> (i32, i32) {
    %c0_i32 = arith.constant 0 : i32
    %c0_i32_0 = arith.constant 0 : i32
    return %arg0, %c0_i32 : i32, i32
  }
}

</mosaic_0001>

<bundles_post_ra>
// kernel: tpu_custom_call.1
= control target key start
LH: loop header
LB: loop body
LE: loop exit
PB: predicated region body
PF: predicated region fallthrough
CT: control target
= control target key end

     0   :  { %9 = vsyncpa [#allocation3], 0  ;;  %s266_s0 = inlined_call_operand.hbm [shape: f32[32,128], index: 0, kind: input, shape index: {}]   ;;  %s267_s1 = inlined_call_operand.hbm [shape: f32[2,128], index: 1, kind: input, shape index: {}]   ;;  %s268_s2 = inlined_call_operand.hbm [shape: f32[32,128], index: 2, kind: output, shape index: {0}]   ;;  %s269_s3 = inlined_call_operand.hbm [shape: f32[32,128], index: 3, kind: output, shape index: {1}]  }
   0x1   :  { %10 = vsyncpa [#allocation6], 0 }
   0x2   :  { %11 = vsyncpa [#allocation4], 0 }
   0x3   :  { %12 = vsyncpa [#allocation9], 0  ;;  %s17_s14 = sshll.u32 %s266_s0, 4  ;;  %s219_s15 = smov [#allocation2]   ;;  %s18_s14 = int_to_ptr.hbm [resolvable:$true] %s17_s14 }
   0x4   :  { %s19_s16 = sshll.u32 %s219_s15, 4  ;;  %s31_s19 = sshll.u32 %s267_s1, 4  ;;  %s20_s16 = int_to_ptr.vmem [resolvable:$true] %s19_s16  ;;  %s32_s19 = int_to_ptr.hbm [resolvable:$true] %s31_s19 }
   0x5   :  { %s220_s20 = smov 128   ;;  %s221_s21 = smov 8  }
   0x6   :  { %25 = dma.hbm_to_vmem [thread:$0]  %s18_s14, 512, %s20_s16, [#allocation3], %s220_s20, %s220_s20, %s221_s21  }
   0x7   :  { %s222_s22 = smov [#allocation5]  }
   0x8   :  { %s33_s23 = sshll.u32 %s222_s22, 4  ;;  %s34_s23 = int_to_ptr.vmem [resolvable:$true] %s33_s23 }
   0x9   :  { %36 = dma.hbm_to_vmem [thread:$0]  %s32_s19, 32, %s34_s23, [#allocation6]  }
   0xa   :  { %211 = dma.done.wait [#allocation3], 512  }
   0xb   :  { %212 = vsyncadd [#allocation3], 4294966784 }
   0xc   :  { %213 = dma.done.wait [#allocation6], 32  }
   0xd   :  { %214 = vsyncadd [#allocation6], 4294967264  ;;  %v45_v0 = vld [vmem:[#allocation2] sm:$0xff]  ;;  %v46_v2 = vld [vmem:[#allocation2 + $0x8] sm:$0xff]  ;;  %s223_s0 = smov [#allocation7]   ;;  %s75_s26 = sshll.u32 %s268_s2, 4  ;;  %s76_s26 = int_to_ptr.hbm [resolvable:$true] %s75_s26 }
   0xe   :  { %v113_v1 = vld [vmem:[#allocation5] ss:$0 sm:$0xff]  ;;  %v47_v3 = vld [vmem:[#allocation2 + $0x10] sm:$0xff]  ;;  %v48_v4 = vld [vmem:[#allocation2 + $0x18] sm:$0xff]  ;;  %s73_s1 = sshll.u32 %s223_s0, 4  ;;  %s224_s27 = smov [#allocation8]   ;;  %s74_s1 = int_to_ptr.vmem [resolvable:$true] %s73_s1 }
   0xf   :  { %v51_v5 = vmul.f32 %v113_v1, %v45_v0  ;;  %v52_v6 = vmul.f32 %v113_v1, %v46_v2  ;;  %v53_v7 = vmul.f32 %v113_v1, %v47_v3  ;;  %v114_v8 = vld [vmem:[#allocation5 + $0x1] ss:$0 sm:$0xff]  ;;  %v54_v9 = vmul.f32 %v113_v1, %v48_v4  ;;  %s86_s28 = sshll.u32 %s224_s27, 4  ;;  %s88_s4 = sshll.u32 %s269_s3, 4  ;;  %s87_s28 = int_to_ptr.vmem [resolvable:$true] %s86_s28  ;;  %s89_s4 = int_to_ptr.hbm [resolvable:$true] %s88_s4 }
  0x10   :  { %v61_v10 = vmul.f32 %v114_v8, %v45_v0  ;;  %v62_v11 = vmul.f32 %v114_v8, %v46_v2  ;;  %v63_v12 = vmul.f32 %v114_v8, %v47_v3  ;;  %v64_v13 = vmul.f32 %v114_v8, %v48_v4 }
  0x11   :  { %55 = vst [vmem:[#allocation7] sm:$0xff] %v51_v5 }
  0x12   :  { %56 = vst [vmem:[#allocation7 + $0x8] sm:$0xff] %v52_v6 }
  0x13   :  { %57 = vst [vmem:[#allocation7 + $0x10] sm:$0xff] %v53_v7 }
  0x14   :  { %58 = vst [vmem:[#allocation7 + $0x18] sm:$0xff] %v54_v9 }
  0x15   :  { %65 = vst [vmem:[#allocation8] sm:$0xff] %v61_v10  ;;  %81 = dma.vmem_to_hbm [thread:$0]  %s74_s1, 512, %s76_s26, [#allocation4], %s220_s20, %s220_s20, %s221_s21  }
  0x16   :  { %66 = vst [vmem:[#allocation8 + $0x8] sm:$0xff] %v62_v11 }
  0x17   :  { %67 = vst [vmem:[#allocation8 + $0x10] sm:$0xff] %v63_v12 }
  0x18   :  { %68 = vst [vmem:[#allocation8 + $0x18] sm:$0xff] %v64_v13 }
  0x19   :  { %94 = dma.vmem_to_hbm [thread:$0]  %s87_s28, 512, %s89_s4, [#allocation9], %s220_s20, %s220_s20, %s221_s21  }
  0x1a   :  { %215 = dma.done.wait [#allocation4], 512  }
  0x1b   :  { %216 = vsyncadd [#allocation4], 4294966784 }
  0x1c   :  { %217 = dma.done.wait [#allocation9], 512  }
  0x1d   :  { %218 = vsyncadd [#allocation9], 4294966784 }
  0x1e   :  { %103 = vsyncpa [#allocation3], 1 }
  0x1f   :  { %104 = vsyncpa [#allocation6], 1 }
  0x20   :  { %105 = vsyncpa [#allocation4], 1 }
  0x21   :  { %106 = vsyncpa [#allocation9], 1 }

</bundles_post_ra>
